<compile_context>
chip_gen: v6e
topology: v6e:2x2x1
jax: 0.10.0
libtpu: 0.0.40
codegen_flags: <defaults>
</compile_context>

<pallas_src>
import numpy as np
import jax
import jax.numpy as jnp
from jax.experimental import pallas as pl
from jax.experimental.pallas import tpu as pltpu

B, CIN, H, W = 2, 4, 6, 6
COUT, KH, KW = 16, 3, 3
OH, OW = H - KH + 1, W - KW + 1          # 4, 4
PH, PW = OH // 2, OW // 2                # 2, 2
NWIN = PH * PW                           # 4 pool windows
FEAT = COUT * NWIN                       # 64 features into the FC
GRP = 128                                # lanes per pool-corner group
NCLS = 2
KIN = CIN * H * W                        # 144 flattened-image inputs
KP = 152                                 # contraction dim padded to a multiple of 8
BP = 8                                   # batch padded to a full sublane tile
NOUT = 128                               # lane-dense padded FC output width
BIAS_LANE = FEAT                         # lane 64: constant-1 carrier for the FC bias


def net_kernel(x_ref, w1_ref, w2_ref, out_ref):
    # Fused im2col + conv (+conv bias, +FC-bias carrier lane): (8,152) @ (152,512).
    y = jnp.dot(x_ref[...], w1_ref[...], preferred_element_type=jnp.float32)
    y = jnp.maximum(y, 0.0)                                       # conv ReLU
    # 2x2 / stride-2 max pool: the 4 corners of every window live in 4
    # vreg-aligned 128-lane groups -> 3 elementwise maxima, no shuffles.
    feat = jnp.maximum(jnp.maximum(y[:, 0:GRP], y[:, GRP:2 * GRP]),
                       jnp.maximum(y[:, 2 * GRP:3 * GRP], y[:, 3 * GRP:4 * GRP]))
    # FC (+fc bias via constant-1 lane 64): (8,128) @ (128,128), lane-dense output.
    logits = jnp.dot(feat, w2_ref[...], preferred_element_type=jnp.float32)
    out_ref[...] = jnp.maximum(logits, 0.0)                       # final ReLU


def _conv_gather_index():
    # idx[g, m] = flat (cin, kh, kw) index of the conv weight feeding output
    # column-group m = q*NWIN + w (q = pool-window corner dy*2+dx, w = ph*PW+pw)
    # from input pixel g = cin*H*W + ih*W + iw; CIN*KH*KW (-> zero row) if that
    # pixel is outside the 3x3 receptive field of that conv output.
    idx = np.full((KIN, 4 * NWIN), CIN * KH * KW, dtype=np.int32)
    for q in range(4):
        dy, dx = divmod(q, 2)
        for w in range(NWIN):
            ph, pw = divmod(w, PW)
            oh, ow = 2 * ph + dy, 2 * pw + dx
            m = q * NWIN + w
            for cin in range(CIN):
                for kh in range(KH):
                    for kw in range(KW):
                        g = cin * (H * W) + (oh + kh) * W + (ow + kw)
                        idx[g, m] = cin * (KH * KW) + kh * KW + kw
    return idx


def prepare_params(conv_w, conv_b, fc_w, fc_b):
    """One-time host-side (numpy) weight repacking. Run once; results are reused
    for every forward call — no per-call gather/pad/tile XLA ops."""
    conv_w = np.asarray(conv_w, np.float32)
    conv_b = np.asarray(conv_b, np.float32)
    fc_w = np.asarray(fc_w, np.float32)
    fc_b = np.asarray(fc_b, np.float32)

    idx = _conv_gather_index()
    w1k = conv_w.reshape(COUT, CIN * KH * KW).T                          # (36, 16)
    w1k_ext = np.concatenate([w1k, np.zeros((1, COUT), np.float32)], 0)  # (37, 16)
    wmain = w1k_ext[idx.reshape(-1)].reshape(KIN, 4, NWIN * COUT)        # (144, 4, 64)
    wmain = np.pad(wmain, ((0, 0), (0, 0), (0, GRP - NWIN * COUT)))      # (144, 4, 128)

    # Fused conv weight, K padded 145 -> 152 with zero rows: (152, 512).
    w1_big = np.zeros((KP, 4 * GRP), np.float32)
    w1_big[:KIN, :] = wmain.reshape(KIN, 4 * GRP)
    # Bias row (driven by the ones column of x_aug): conv_b in lanes 0..63 of each
    # group plus a constant 1 in lane 64 that carries the FC bias through ReLU+pool.
    brow_grp = np.zeros((GRP,), np.float32)
    brow_grp[:NWIN * COUT] = np.tile(conv_b, NWIN)
    brow_grp[BIAS_LANE] = 1.0
    w1_big[KIN, :] = np.tile(brow_grp, 4)

    # FC weight permuted to the kernel's window-major feature order (lane l = w*COUT+cout
    # <-> torch flatten index cout*NWIN + w), fc_b folded into row 64, padded lane-dense
    # to (128, 128) with zero columns.
    perm = np.zeros(FEAT, dtype=np.int32)
    for cout in range(COUT):
        for w in range(NWIN):
            perm[w * COUT + cout] = cout * NWIN + w
    w2_big = np.zeros((GRP, NOUT), np.float32)
    w2_big[:FEAT, :NCLS] = fc_w.T[perm, :]
    w2_big[BIAS_LANE, :NCLS] = fc_b

    return jnp.asarray(w1_big), jnp.asarray(w2_big)


def net_forward(x, w1_big, w2_big):
    # Per-call work: just the padded input slab (layout plumbing) + one pallas_call.
    x_flat = x.astype(jnp.float32).reshape(B, KIN)
    x_aug = jnp.zeros((BP, KP), jnp.float32)
    x_aug = x_aug.at[:B, :KIN].set(x_flat)
    x_aug = x_aug.at[:B, KIN].set(1.0)          # ones column drives the bias row

    def full(shape):
        return pl.BlockSpec(shape, lambda i, _n=len(shape): (0,) * _n)

    out = pl.pallas_call(
        net_kernel,
        out_shape=jax.ShapeDtypeStruct((BP, NOUT), jnp.float32),
        grid=(1,),
        in_specs=[full((BP, KP)),
                  full((KP, 4 * GRP)),
                  full((GRP, NOUT))],
        out_specs=full((BP, NOUT)),
        compiler_params=pltpu.CompilerParams(dimension_semantics=("arbitrary",)),
    )(x_aug, w1_big, w2_big)
    return out[:B, :NCLS]


def reference(x, conv_w, conv_b, fc_w, fc_b):
    y = jax.lax.conv_general_dilated(
        x, conv_w, window_strides=(1, 1), padding='VALID',
        dimension_numbers=('NCHW', 'OIHW', 'NCHW'))
    y = y + conv_b[None, :, None, None]
    y = jnp.maximum(y, 0.0)
    y = y.reshape(B, COUT, PH, 2, PW, 2).max(axis=(3, 5))
    y = y.reshape(B, FEAT)
    y = y @ fc_w.T + fc_b
    return jnp.maximum(y, 0.0)


if __name__ == "__main__":
    key = jax.random.PRNGKey(0)
    kx, kw1, kb1, kw2, kb2 = jax.random.split(key, 5)
    x = jax.random.normal(kx, (B, CIN, H, W), dtype=jnp.float32)
    conv_w = 0.1 * jax.random.normal(kw1, (COUT, CIN, KH, KW), dtype=jnp.float32)
    conv_b = 0.1 * jax.random.normal(kb1, (COUT,), dtype=jnp.float32)
    fc_w = 0.1 * jax.random.normal(kw2, (NCLS, FEAT), dtype=jnp.float32)
    fc_b = 0.1 * jax.random.normal(kb2, (NCLS,), dtype=jnp.float32)

    # One-time weight repacking (hoisted out of the per-call forward).
    w1_big, w2_big = prepare_params(conv_w, conv_b, fc_w, fc_b)

    fwd = jax.jit(net_forward)
    out = jax.block_until_ready(fwd(x, w1_big, w2_big))

    ref = reference(x, conv_w, conv_b, fc_w, fc_b)
    np.testing.assert_allclose(np.asarray(out), np.asarray(ref),
                               rtol=1e-4, atol=1e-4)
    print("KERNEL_OK")
</pallas_src>

<mosaic_0001>
module attributes {stable_mosaic.version = 11 : i64} {
  func.func @net_kernel(%arg0: i32, %arg1: memref<8x152xf32, #tpu.memory_space<vmem>>, %arg2: memref<152x512xf32, #tpu.memory_space<vmem>>, %arg3: memref<128x128xf32, #tpu.memory_space<vmem>>, %arg4: memref<8x128xf32, #tpu.memory_space<vmem>>) attributes {dimension_semantics = [#tpu.dimension_semantics<arbitrary>], iteration_bounds = array<i64: 1>, scalar_prefetch = 0 : i64, scratch_operands = 0 : i64, tpu.core_type = #tpu.core_type<tc>, window_params = [{pipeline_mode = #tpu.pipeline_mode<synchronous>, transform_indices = @transform_0, window_bounds = array<i64: 8, 152>}, {pipeline_mode = #tpu.pipeline_mode<synchronous>, transform_indices = @transform_1, window_bounds = array<i64: 152, 512>}, {pipeline_mode = #tpu.pipeline_mode<synchronous>, transform_indices = @transform_2, window_bounds = array<i64: 128, 128>}, {pipeline_mode = #tpu.pipeline_mode<synchronous>, transform_indices = @transform_3, window_bounds = array<i64: 8, 128>}]} {
    %c0 = arith.constant 0 : index
    %c0_0 = arith.constant 0 : index
    %0 = vector.load %arg1[%c0, %c0_0] : memref<8x152xf32, #tpu.memory_space<vmem>>, vector<8x152xf32>
    %c0_1 = arith.constant 0 : index
    %c0_2 = arith.constant 0 : index
    %1 = vector.load %arg2[%c0_1, %c0_2] : memref<152x512xf32, #tpu.memory_space<vmem>>, vector<152x512xf32>
    %cst = arith.constant dense<0.000000e+00> : vector<8x512xf32>
    %2 = tpu.matmul %0, %1, %cst {dimension_numbers = #tpu.dot_dimension_numbers<[1], [0], [0], [1], [0, 0, 1, 1], [], []>} : vector<8x152xf32>, vector<152x512xf32>, vector<8x512xf32> -> vector<8x512xf32>
    %cst_3 = arith.constant 0.000000e+00 : f32
    %3 = vector.broadcast %cst_3 : f32 to vector<8x512xf32>
    %4 = arith.maximumf %2, %3 : vector<8x512xf32>
    %5 = vector.extract_strided_slice %4 {offsets = [0, 0], sizes = [8, 128], strides = [1, 1]} : vector<8x512xf32> to vector<8x128xf32>
    %6 = vector.extract_strided_slice %4 {offsets = [0, 128], sizes = [8, 128], strides = [1, 1]} : vector<8x512xf32> to vector<8x128xf32>
    %7 = arith.maximumf %5, %6 : vector<8x128xf32>
    %8 = vector.extract_strided_slice %4 {offsets = [0, 256], sizes = [8, 128], strides = [1, 1]} : vector<8x512xf32> to vector<8x128xf32>
    %9 = vector.extract_strided_slice %4 {offsets = [0, 384], sizes = [8, 128], strides = [1, 1]} : vector<8x512xf32> to vector<8x128xf32>
    %10 = arith.maximumf %8, %9 : vector<8x128xf32>
    %11 = arith.maximumf %7, %10 : vector<8x128xf32>
    %c0_4 = arith.constant 0 : index
    %c0_5 = arith.constant 0 : index
    %12 = vector.load %arg3[%c0_4, %c0_5] : memref<128x128xf32, #tpu.memory_space<vmem>>, vector<128x128xf32>
    %cst_6 = arith.constant dense<0.000000e+00> : vector<8x128xf32>
    %13 = tpu.matmul %11, %12, %cst_6 {dimension_numbers = #tpu.dot_dimension_numbers<[1], [0], [0], [1], [0, 0, 1, 1], [], []>} : vector<8x128xf32>, vector<128x128xf32>, vector<8x128xf32> -> vector<8x128xf32>
    %cst_7 = arith.constant 0.000000e+00 : f32
    %14 = vector.broadcast %cst_7 : f32 to vector<8x128xf32>
    %15 = arith.maximumf %13, %14 : vector<8x128xf32>
    %c0_8 = arith.constant 0 : index
    %c0_9 = arith.constant 0 : index
    %16 = vector.load %arg4[%c0_8, %c0_9] : memref<8x128xf32, #tpu.memory_space<vmem>>, vector<8x128xf32>
    tpu.vector_store %arg4[%c0_8, %c0_9], %15 {strides = array<i32>} : memref<8x128xf32, #tpu.memory_space<vmem>>, vector<8x128xf32>,
    return
  }
  func.func @transform_0(%arg0: i32) -> (i32, i32) {
    %c0_i32 = arith.constant 0 : i32
    %c0_i32_0 = arith.constant 0 : i32
    %c0_i32_1 = arith.constant 0 : i32
    return %c0_i32, %c0_i32_0 : i32, i32
  }
  func.func @transform_1(%arg0: i32) -> (i32, i32) {
    %c0_i32 = arith.constant 0 : i32
    %c0_i32_0 = arith.constant 0 : i32
    %c0_i32_1 = arith.constant 0 : i32
    return %c0_i32, %c0_i32_0 : i32, i32
  }
  func.func @transform_2(%arg0: i32) -> (i32, i32) {
    %c0_i32 = arith.constant 0 : i32
    %c0_i32_0 = arith.constant 0 : i32
    %c0_i32_1 = arith.constant 0 : i32
    return %c0_i32, %c0_i32_0 : i32, i32
  }
  func.func @transform_3(%arg0: i32) -> (i32, i32) {
    %c0_i32 = arith.constant 0 : i32
    %c0_i32_0 = arith.constant 0 : i32
    %c0_i32_1 = arith.constant 0 : i32
    return %c0_i32, %c0_i32_0 : i32, i32
  }
}

</mosaic_0001>

<bundles_post_ra>
// kernel: net_forward.1
= control target key start
LH: loop header
LB: loop body
LE: loop exit
PB: predicated region body
PF: predicated region fallthrough
CT: control target
= control target key end

     0   :  { %8 = vsyncpa [#allocation3], 0  ;;  %s433_s12 = smov [#allocation2]   ;;  %s518_s0 = inlined_call_operand.vmem [shape: f32[8,152], index: 0, kind: input, shape index: {}]   ;;  %s519_s1 = inlined_call_operand.hbm [shape: f32[152,512], index: 1, kind: input, shape index: {}]   ;;  %s520_s2 = inlined_call_operand.vmem [shape: f32[128,128], index: 2, kind: input, shape index: {}]   ;;  %s521_s3 = inlined_call_operand.vmem [shape: f32[8,128], index: 3, kind: output, shape index: {}]  }
   0x1   :  { %s16_s13 = sshll.u32 %s433_s12, 4  ;;  %s17_s13 = int_to_ptr.vmem [resolvable:$true] %s16_s13 }
   0x2   :  { %s419_s14 = scalar_lea.vmem %s17_s13, 9728  ;;  %p424_p1 = scmp.lt.s32.totalorder %s17_s13, %s17_s13 }
   0x3   :  { %p420_p0 = scmp.ne.s32.totalorder %s17_s13, %s419_s14  ;;  %p425_p2 = scmp.lt.s32.totalorder %s419_s14, %s419_s14 }
   0x5   :  { %p426_p3 = por %p425_p2, %p424_p1 }
   0x7   :  { %p427_p4 = pnand %p426_p3, %p420_p0 }
   0x9   :  { %430 = shalt.err (!%p427_p4)
}
   0xa   :  { %s434_s15 = smov 512   ;;  %s435_s16 = smov 32  }
   0xb   :  { %22 = dma.hbm_to_vmem [thread:$0]  %s519_s1, 9728, %s17_s13, [#allocation3], %s434_s15, %s434_s15, %s435_s16  }
   0xc   :  { %431 = dma.done.wait [#allocation3], 9728  }
   0xd   :  { %432 = vsyncadd [#allocation3], 4294957568  ;;  %v91_v0 = vld [vmem:[#allocation2 + $0x1e8] sm:$0xff]  ;;  %v93_v1 = vld [vmem:[#allocation2 + $0x1f8] sm:$0xff]  ;;  %vm106_vm0 = vcmask 195584   ;;  %vm437_vm1 = vmmov 0  }
   0xe   :  { %v90_v2 = vld [vmem:[#allocation2 + $0x1e0] sm:$0xff]  ;;  %110 = vmatprep.subr.mxu0 %v91_v0  ;;  %181 = vmatprep.subr.mxu1 %v93_v1  ;;  %v92_v3 = vld [vmem:[#allocation2 + $0x1f0] sm:$0xff]  ;;  %v87_v4 = vld [vmem:[#allocation2 + $0x1c8] sm:$0xff] }
   0xf   :  { %v89_v5 = vld [vmem:[#allocation2 + $0x1d8] sm:$0xff]  ;;  %111 = vmatpush1.msra.mxu0 %v90_v2  ;;  %182 = vmatpush1.msra.mxu1 %v92_v3  ;;  %v86_v6 = vld [vmem:[#allocation2 + $0x1c0] sm:$0xff]  ;;  %v88_v7 = vld [vmem:[#allocation2 + $0x1d0] sm:$0xff] }
  0x10   :  { %v83_v8 = vld [vmem:[#allocation2 + $0x1a8] sm:$0xff]  ;;  %112 = vmatprep.subr.mxu0 %v87_v4  ;;  %183 = vmatprep.subr.mxu1 %v89_v5  ;;  %v85_v9 = vld [vmem:[#allocation2 + $0x1b8] sm:$0xff]  ;;  %v82_v10 = vld [vmem:[#allocation2 + $0x1a0] sm:$0xff] }
  0x11   :  { %v84_v11 = vld [vmem:[#allocation2 + $0x1b0] sm:$0xff]  ;;  %113 = vmatpush1.msra.mxu0 %v86_v6  ;;  %184 = vmatpush1.msra.mxu1 %v88_v7  ;;  %v79_v12 = vld [vmem:[#allocation2 + $0x188] sm:$0xff]  ;;  %v81_v13 = vld [vmem:[#allocation2 + $0x198] sm:$0xff] }
  0x12   :  { %114 = vmatprep.subr.mxu0 %v83_v8  ;;  %185 = vmatprep.subr.mxu1 %v85_v9  ;;  %v78_v14 = vld [vmem:[#allocation2 + $0x180] sm:$0xff]  ;;  %v80_v15 = vld [vmem:[#allocation2 + $0x190] sm:$0xff]  ;;  %v75_v16 = vld [vmem:[#allocation2 + $0x168] sm:$0xff] }
  0x13   :  { %115 = vmatpush1.msra.mxu0 %v82_v10  ;;  %186 = vmatpush1.msra.mxu1 %v84_v11  ;;  %v77_v17 = vld [vmem:[#allocation2 + $0x178] sm:$0xff]  ;;  %v74_v18 = vld [vmem:[#allocation2 + $0x160] sm:$0xff]  ;;  %v76_v19 = vld [vmem:[#allocation2 + $0x170] sm:$0xff] }
  0x14   :  { %116 = vmatprep.subr.mxu0 %v79_v12  ;;  %187 = vmatprep.subr.mxu1 %v81_v13  ;;  %v71_v20 = vld [vmem:[#allocation2 + $0x148] sm:$0xff]  ;;  %v73_v21 = vld [vmem:[#allocation2 + $0x158] sm:$0xff]  ;;  %v70_v22 = vld [vmem:[#allocation2 + $0x140] sm:$0xff] }
  0x15   :  { %117 = vmatpush1.msra.mxu0 %v78_v14  ;;  %188 = vmatpush1.msra.mxu1 %v80_v15  ;;  %v72_v23 = vld [vmem:[#allocation2 + $0x150] sm:$0xff]  ;;  %v67_v24 = vld [vmem:[#allocation2 + $0x128] sm:$0xff]  ;;  %v69_v25 = vld [vmem:[#allocation2 + $0x138] sm:$0xff]  ;;  %v436_v15 = vmov 0.0  }
  0x16   :  { %118 = vmatprep.subr.mxu0 %v75_v16  ;;  %189 = vmatprep.subr.mxu1 %v77_v17  ;;  %v66_v26 = vld [vmem:[#allocation2 + $0x120] sm:$0xff]  ;;  %v68_v27 = vld [vmem:[#allocation2 + $0x130] sm:$0xff]  ;;  %v63_v28 = vld [vmem:[#allocation2 + $0x108] sm:$0xff] }
  0x17   :  { %119 = vmatpush1.msra.mxu0 %v74_v18  ;;  %190 = vmatpush1.msra.mxu1 %v76_v19  ;;  %v65_v29 = vld [vmem:[#allocation2 + $0x118] sm:$0xff]  ;;  %v62_v30 = vld [vmem:[#allocation2 + $0x100] sm:$0xff]  ;;  %v64_v31 = vld [vmem:[#allocation2 + $0x110] sm:$0xff] }
  0x18   :  { %120 = vmatprep.subr.mxu0 %v71_v20  ;;  %191 = vmatprep.subr.mxu1 %v73_v21  ;;  %v59_v32 = vld [vmem:[#allocation2 + $0xe8] sm:$0xff]  ;;  %v61_v33 = vld [vmem:[#allocation2 + $0xf8] sm:$0xff]  ;;  %v58_v34 = vld [vmem:[#allocation2 + $0xe0] sm:$0xff] }
  0x19   :  { %121 = vmatpush1.msra.mxu0 %v70_v22  ;;  %192 = vmatpush1.msra.mxu1 %v72_v23  ;;  %v60_v35 = vld [vmem:[#allocation2 + $0xf0] sm:$0xff]  ;;  %v55_v36 = vld [vmem:[#allocation2 + $0xc8] sm:$0xff]  ;;  %v57_v37 = vld [vmem:[#allocation2 + $0xd8] sm:$0xff] }
  0x1a   :  { %122 = vmatprep.subr.mxu0 %v67_v24  ;;  %193 = vmatprep.subr.mxu1 %v69_v25  ;;  %v54_v38 = vld [vmem:[#allocation2 + $0xc0] sm:$0xff]  ;;  %v56_v39 = vld [vmem:[#allocation2 + $0xd0] sm:$0xff]  ;;  %v51_v40 = vld [vmem:[#allocation2 + $0xa8] sm:$0xff] }
  0x1b   :  { %123 = vmatpush1.msra.mxu0 %v66_v26  ;;  %194 = vmatpush1.msra.mxu1 %v68_v27  ;;  %v53_v41 = vld [vmem:[#allocation2 + $0xb8] sm:$0xff]  ;;  %v50_v42 = vld [vmem:[#allocation2 + $0xa0] sm:$0xff]  ;;  %v52_v43 = vld [vmem:[#allocation2 + $0xb0] sm:$0xff] }
  0x1c   :  { %124 = vmatprep.subr.mxu0 %v63_v28  ;;  %195 = vmatprep.subr.mxu1 %v65_v29  ;;  %v47_v44 = vld [vmem:[#allocation2 + $0x88] sm:$0xff]  ;;  %v49_v45 = vld [vmem:[#allocation2 + $0x98] sm:$0xff]  ;;  %v46_v46 = vld [vmem:[#allocation2 + $0x80] sm:$0xff] }
  0x1d   :  { %125 = vmatpush1.msra.mxu0 %v62_v30  ;;  %196 = vmatpush1.msra.mxu1 %v64_v31  ;;  %v48_v47 = vld [vmem:[#allocation2 + $0x90] sm:$0xff]  ;;  %v43_v48 = vld [vmem:[#allocation2 + $0x68] sm:$0xff]  ;;  %v45_v49 = vld [vmem:[#allocation2 + $0x78] sm:$0xff] }
  0x1e   :  { %126 = vmatprep.subr.mxu0 %v59_v32  ;;  %197 = vmatprep.subr.mxu1 %v61_v33  ;;  %v42_v50 = vld [vmem:[#allocation2 + $0x60] sm:$0xff]  ;;  %v44_v51 = vld [vmem:[#allocation2 + $0x70] sm:$0xff]  ;;  %v39_v52 = vld [vmem:[#allocation2 + $0x48] sm:$0xff] }
  0x1f   :  { %127 = vmatpush1.msra.mxu0 %v58_v34  ;;  %198 = vmatpush1.msra.mxu1 %v60_v35  ;;  %v41_v53 = vld [vmem:[#allocation2 + $0x58] sm:$0xff]  ;;  %v38_v54 = vld [vmem:[#allocation2 + $0x40] sm:$0xff]  ;;  %v40_v55 = vld [vmem:[#allocation2 + $0x50] sm:$0xff] }
  0x20   :  { %128 = vmatprep.subr.mxu0 %v55_v36  ;;  %199 = vmatprep.subr.mxu1 %v57_v37  ;;  %v35_v56 = vld [vmem:[#allocation2 + $0x28] sm:$0xff]  ;;  %v37_v57 = vld [vmem:[#allocation2 + $0x38] sm:$0xff]  ;;  %v34_v58 = vld [vmem:[#allocation2 + $0x20] sm:$0xff] }
  0x21   :  { %129 = vmatpush1.msra.mxu0 %v54_v38  ;;  %200 = vmatpush1.msra.mxu1 %v56_v39  ;;  %v36_v59 = vld [vmem:[#allocation2 + $0x30] sm:$0xff]  ;;  %v31_v60 = vld [vmem:[#allocation2 + $0x8] sm:$0xff]  ;;  %v33_v61 = vld [vmem:[#allocation2 + $0x18] sm:$0xff] }
  0x22   :  { %130 = vmatprep.subr.mxu0 %v51_v40  ;;  %201 = vmatprep.subr.mxu1 %v53_v41  ;;  %v30_v62 = vld [vmem:[#allocation2] sm:$0xff]  ;;  %v32_v63 = vld [vmem:[#allocation2 + $0x10] sm:$0xff]  ;;  %v103_v0 = vld [vmem:[#allocation2 + $0x248] sm:$0xff] }
  0x23   :  { %131 = vmatpush1.msra.mxu0 %v50_v42  ;;  %202 = vmatpush1.msra.mxu1 %v52_v43  ;;  %v105_v1 = vld [vmem:[#allocation2 + $0x258] sm:$0xff]  ;;  %v102_v2 = vld [vmem:[#allocation2 + $0x240] sm:$0xff]  ;;  %v104_v3 = vld [vmem:[#allocation2 + $0x250] sm:$0xff] }
  0x24   :  { %132 = vmatprep.subr.mxu0 %v47_v44  ;;  %203 = vmatprep.subr.mxu1 %v49_v45  ;;  %v99_v4 = vld [vmem:[#allocation2 + $0x228] sm:$0xff]  ;;  %v101_v5 = vld [vmem:[#allocation2 + $0x238] sm:$0xff]  ;;  %v98_v6 = vld [vmem:[#allocation2 + $0x220] sm:$0xff] }
  0x25   :  { %133 = vmatpush1.msra.mxu0 %v46_v46  ;;  %204 = vmatpush1.msra.mxu1 %v48_v47  ;;  %v100_v7 = vld [vmem:[#allocation2 + $0x230] sm:$0xff]  ;;  %v95_v8 = vld [vmem:[#allocation2 + $0x208] sm:$0xff]  ;;  %v97_v9 = vld [vmem:[#allocation2 + $0x218] sm:$0xff] }
  0x26   :  { %134 = vmatprep.subr.mxu0 %v43_v48  ;;  %205 = vmatprep.subr.mxu1 %v45_v49  ;;  %v94_v10 = vld [vmem:[#allocation2 + $0x200] sm:$0xff]  ;;  %v29_v11 = vld [vmem:[%s518_s0 + $0x8] sm:$0xff]  ;;  %v96_v12 = vld [vmem:[#allocation2 + $0x210] sm:$0xff] }
  0x27   :  { %135 = vmatpush1.msra.mxu0 %v42_v50  ;;  %206 = vmatpush1.msra.mxu1 %v44_v51  ;;  %v28_v13 = vld [vmem:[%s518_s0] sm:$0xff]  ;;  %v274_v14 = vld [vmem:[%s520_s2 + $0x78] sm:$0xff]  ;;  %v273_v16 = vld [vmem:[%s520_s2 + $0x70] sm:$0xff] }
  0x28   :  { %136 = vmatprep.subr.mxu0 %v39_v52  ;;  %207 = vmatprep.subr.mxu1 %v41_v53  ;;  %v272_v17 = vld [vmem:[%s520_s2 + $0x68] sm:$0xff]  ;;  %v271_v18 = vld [vmem:[%s520_s2 + $0x60] sm:$0xff]  ;;  %v270_v19 = vld [vmem:[%s520_s2 + $0x58] sm:$0xff] }
  0x29   :  { %137 = vmatpush1.msra.mxu0 %v38_v54  ;;  %208 = vmatpush1.msra.mxu1 %v40_v55  ;;  %v269_v20 = vld [vmem:[%s520_s2 + $0x50] sm:$0xff]  ;;  %v268_v21 = vld [vmem:[%s520_s2 + $0x48] sm:$0xff]  ;;  %v267_v22 = vld [vmem:[%s520_s2 + $0x40] sm:$0xff] }
  0x2a   :  { %138 = vmatprep.subr.mxu0 %v35_v56  ;;  %209 = vmatprep.subr.mxu1 %v37_v57  ;;  %v266_v23 = vld [vmem:[%s520_s2 + $0x38] sm:$0xff]  ;;  %v265_v24 = vld [vmem:[%s520_s2 + $0x30] sm:$0xff]  ;;  %v264_v25 = vld [vmem:[%s520_s2 + $0x28] sm:$0xff] }
  0x2b   :  { %139 = vmatpush1.msra.mxu0 %v34_v58  ;;  %210 = vmatpush1.msra.mxu1 %v36_v59  ;;  %v263_v26 = vld [vmem:[%s520_s2 + $0x20] sm:$0xff]  ;;  %v262_v27 = vld [vmem:[%s520_s2 + $0x18] sm:$0xff]  ;;  %v261_v28 = vld [vmem:[%s520_s2 + $0x10] sm:$0xff] }
  0x2c   :  { %140 = vmatprep.subr.mxu0 %v31_v60  ;;  %211 = vmatprep.subr.mxu1 %v33_v61  ;;  %v260_v29 = vld [vmem:[%s520_s2 + $0x8] sm:$0xff]  ;;  %v259_v30 = vld [vmem:[%s520_s2] sm:$0xff] }
  0x2d   :  { %141 = vmatpush1.msra.mxu0 %v30_v62  ;;  %212 = vmatpush1.msra.mxu1 %v32_v63 }
  0x2e   :  { %168 = vmatprep.subr.mxu0 %v103_v0  ;;  %239 = vmatprep.subr.mxu1 %v105_v1 }
  0x2f   :  { %169 = vmatpush2.msra.mxu0 %v102_v2  ;;  %240 = vmatpush2.msra.mxu1 %v104_v3 }
  0x30   :  { %170 = vmatprep.subr.mxu0 %v99_v4  ;;  %241 = vmatprep.subr.mxu1 %v101_v5 }
  0x31   :  { %171 = vmatpush2.msra.mxu0 %v98_v6  ;;  %242 = vmatpush2.msra.mxu1 %v100_v7 }
  0x32   :  { %172 = vmatprep.subr.mxu0 %v95_v8  ;;  %243 = vmatprep.subr.mxu1 %v97_v9 }
  0x33   :  { %173 = vmatpush2.msra.mxu0 %v94_v10  ;;  %352 = vmatprep.mubr.msk.f32.mxu0 %vm106_vm0, %v29_v11 }
  0x34   :  { %244 = vmatpush2.msra.mxu1 %v96_v12  ;;  %353 = vmatprep.mubr.msk.f32.mxu1 %vm106_vm0, %v29_v11 }
  0x35   :  { %175 = vmatmul.mubr.f32.vlgmr.msra.gmra.mxu0 %v28_v13  ;;  %246 = vmatmul.mubr.f32.vlgmr.msra.gmra.mxu1 %v28_v13 }
  0x36   :  { %371 = vmatprep.subr.mxu0 %v436_v15  ;;  %403 = vmatprep.mubr.msk.f32.mxu0 %vm437_vm1, %v436_v15 }
  0x37   :  { %372 = vmatpush3.msra.mxu0 %v274_v14 }
  0x38   :  { %373 = vmatprep.subr.mxu0 %v436_v15 }
  0x39   :  { %374 = vmatpush3.msra.mxu0 %v273_v16 }
  0x3a   :  { %375 = vmatprep.subr.mxu0 %v436_v15 }
  0x3b   :  { %376 = vmatpush3.msra.mxu0 %v272_v17 }
  0x3c   :  { %377 = vmatprep.subr.mxu0 %v436_v15 }
  0x3d   :  { %378 = vmatpush3.msra.mxu0 %v271_v18 }
  0x3e   :  { %379 = vmatprep.subr.mxu0 %v436_v15 }
  0x3f   :  { %380 = vmatpush3.msra.mxu0 %v270_v19 }
  0x40   :  { %381 = vmatprep.subr.mxu0 %v436_v15 }
  0x41   :  { %382 = vmatpush3.msra.mxu0 %v269_v20 }
  0x42   :  { %383 = vmatprep.subr.mxu0 %v436_v15 }
  0x43   :  { %384 = vmatpush3.msra.mxu0 %v268_v21 }
  0x44   :  { %385 = vmatprep.subr.mxu0 %v436_v15 }
  0x45   :  { %386 = vmatpush3.msra.mxu0 %v267_v22 }
  0x46   :  { %387 = vmatprep.subr.mxu0 %v436_v15 }
  0x47   :  { %388 = vmatpush3.msra.mxu0 %v266_v23 }
  0x48   :  { %389 = vmatprep.subr.mxu0 %v436_v15 }
  0x49   :  { %390 = vmatpush3.msra.mxu0 %v265_v24 }
  0x4a   :  { %391 = vmatprep.subr.mxu0 %v436_v15 }
  0x4b   :  { %392 = vmatpush3.msra.mxu0 %v264_v25 }
  0x4c   :  { %393 = vmatprep.subr.mxu0 %v436_v15 }
  0x4d   :  { %394 = vmatpush3.msra.mxu0 %v263_v26 }
  0x4e   :  { %395 = vmatprep.subr.mxu0 %v436_v15 }
  0x4f   :  { %396 = vmatpush3.msra.mxu0 %v262_v27 }
  0x50   :  { %397 = vmatprep.subr.mxu0 %v436_v15 }
  0x51   :  { %398 = vmatpush3.msra.mxu0 %v261_v28 }
  0x52   :  { %399 = vmatprep.subr.mxu0 %v436_v15 }
  0x53   :  { %400 = vmatpush3.msra.mxu0 %v260_v29 }
  0x54   :  { %401 = vmatprep.subr.mxu0 %v436_v15 }
  0x55   :  { %402 = vmatpush3.msra.mxu0 %v259_v30 }
  0xf5   :  { %v176_v31 = vpop.f32.mrf.mxu0  ;;  %v247_v32 = vpop.f32.mrf.mxu1 }
  0xf6   :  { %v252_v35 = vmax.f32 %v176_v31, 0.0  ;;  %v254_v36 = vmax.f32 %v247_v32, 0.0 }
  0xf7   :  { %v178_v33 = vpop.f32.mrf.mxu0  ;;  %v249_v34 = vpop.f32.mrf.mxu1 }
  0xf8   :  { %v253_v37 = vmax.f32 %v178_v33, 0.0  ;;  %v255_v38 = vmax.f32 %v249_v34, 0.0 }
  0xfa   :  { %v256_v39 = vmax.f32 %v252_v35, %v253_v37  ;;  %v257_v40 = vmax.f32 %v254_v36, %v255_v38 }
  0xfc   :  { %v258_v41 = vmax.f32 %v256_v39, %v257_v40 }
  0xfe   :  { %404 = vmatmul.mubr.f32.vlgmr.msra.gmra.mxu0 %v258_v41 }
 0x1be   :  { %v341_v42 = vpop.f32.mrf.mxu0 }
 0x1bf   :  { %v345_v43 = vmax.f32 %v341_v42, 0.0 }
 0x1c0   :  { %v405_v44 = vpop.f32.mrf.mxu0 }
 0x1c1   :  { %346 = vst [vmem:[%s521_s3] sm:$0xff] %v345_v43 }
 0x1c2   :  { %351 = vsyncpa [#allocation3], 1 }

</bundles_post_ra>
